<compile_context>
chip_gen: v7x
topology: tpu7x:2x2x1
jax: 0.10.0
libtpu: 0.0.40
codegen_flags: <defaults>
</compile_context>

<pallas_src>
import functools

import jax
import jax.numpy as jnp
from jax import lax
from jax.experimental import pallas as pl
from jax.experimental.pallas import tpu as pltpu


def _gap_single_kernel(x_ref, o_ref, *, inv_hw):
    # One k step covers the whole H*W axis: sum (f32-accumulated) and scale.
    s = jnp.sum(x_ref[...], axis=-1, keepdims=True, dtype=jnp.float32)
    o_ref[...] = (s * inv_hw).astype(o_ref.dtype)


def _gap_tiled_kernel(x_ref, o_ref, acc_ref, *, hw, tm, tk, inv_hw):
    # x_ref:   (tm, tk) tile of the flattened (rows, H*W) input
    # o_ref:   (tm, 1)  per-row mean output block (resident across the k axis)
    # acc_ref: (tm, 128) f32 per-lane partial-sum accumulator
    k = pl.program_id(1)

    @pl.when(k == 0)
    def _init():
        acc_ref[...] = jnp.zeros_like(acc_ref)

    ragged = (hw % tk) != 0      # static: last k tile overhangs the array
    n_groups = tk // 128         # static: tk is a multiple of 128 on this path
    base_col = k * tk

    # Hot loop: pure vld + vadd on full vregs; no per-step cross-lane reduce.
    part = acc_ref[...]
    for j in range(n_groups):
        chunk = x_ref[:, j * 128:(j + 1) * 128].astype(jnp.float32)
        if ragged:
            col = base_col + (
                j * 128 + lax.broadcasted_iota(jnp.int32, (tm, 128), 1))
            chunk = jnp.where(col < hw, chunk, 0.0)
        part = part + chunk
    acc_ref[...] = part

    @pl.when(k == pl.num_programs(1) - 1)
    def _finalize():
        s = jnp.sum(acc_ref[...], axis=-1, keepdims=True)
        o_ref[...] = (s * inv_hw).astype(o_ref.dtype)


def global_avg_pooling(x, *, tm_target=256, block_bytes=4 * 1024 * 1024):
    """x: (N, C, H, W) -> (N, C), mean over the last two dims."""
    N, C, H, W = x.shape
    rows = N * C
    hw = H * W
    itemsize = jnp.dtype(x.dtype).itemsize

    # Flatten: rows -> sublane axis, H*W -> lane (reduction) axis. Free for
    # contiguous NCHW memory.
    x2 = x.reshape(rows, hw)

    # Row tiling. Full-dim block when it fits; otherwise 256 (multiple of 32,
    # legal for f32/bf16/int8 sublane packing). Ragged last row tile is fine:
    # garbage rows produce garbage sums whose OOB output writes are discarded.
    tm = rows if rows <= tm_target else tm_target

    # Reduction tiling from a per-buffer byte budget (dtype-aware).
    tk_cap = max(128, (block_bytes // (tm * itemsize)) // 128 * 128)

    inv_hw = float(1.0 / hw)
    out_shape = jax.ShapeDtypeStruct((rows, 1), x.dtype)
    cost = pl.CostEstimate(
        flops=rows * hw,
        transcendentals=0,
        bytes_accessed=rows * hw * itemsize + rows * itemsize,
    )
    grid_m = pl.cdiv(rows, tm)

    if hw <= tk_cap:
        # Single reduction step: tk equals the full H*W dim (no 128-multiple
        # requirement, no padding, one contiguous DMA per row tile).
        tk = hw
        kernel = functools.partial(_gap_single_kernel, inv_hw=inv_hw)
        out = pl.pallas_call(
            kernel,
            out_shape=out_shape,
            grid_spec=pltpu.PrefetchScalarGridSpec(
                num_scalar_prefetch=0,
                grid=(grid_m,),
                in_specs=[pl.BlockSpec((tm, tk), lambda i: (i, 0))],
                out_specs=pl.BlockSpec((tm, 1), lambda i: (i, 0)),
            ),
            compiler_params=pltpu.CompilerParams(
                dimension_semantics=("parallel",)),
            cost_estimate=cost,
        )(x2)
    else:
        # Tiled reduction: tk is a multiple of 128; ragged tail masked in-kernel.
        tk = tk_cap
        grid_k = pl.cdiv(hw, tk)
        kernel = functools.partial(
            _gap_tiled_kernel, hw=hw, tm=tm, tk=tk, inv_hw=inv_hw)
        out = pl.pallas_call(
            kernel,
            out_shape=out_shape,
            grid_spec=pltpu.PrefetchScalarGridSpec(
                num_scalar_prefetch=0,
                grid=(grid_m, grid_k),
                in_specs=[pl.BlockSpec((tm, tk), lambda i, k: (i, k))],
                out_specs=pl.BlockSpec((tm, 1), lambda i, k: (i, 0)),
                scratch_shapes=[pltpu.VMEM((tm, 128), jnp.float32)],
            ),
            compiler_params=pltpu.CompilerParams(
                dimension_semantics=("parallel", "arbitrary")),
            cost_estimate=cost,
        )(x2)

    return out[:, 0].reshape(N, C)


if __name__ == "__main__":
    key = jax.random.PRNGKey(0)

    # Main check: single-step path (hw fits in one block, no padding anywhere).
    N, C, H, W = 2, 4, 16, 16
    x = jax.random.normal(key, (N, C, H, W), dtype=jnp.float32)
    out = jax.block_until_ready(global_avg_pooling(x))
    ref = jnp.mean(jnp.mean(x, axis=-1), axis=-1)
    assert out.shape == (N, C), out.shape
    assert jnp.allclose(out, ref, atol=1e-5, rtol=1e-5), (
        jnp.max(jnp.abs(out - ref)))

    # Secondary check: force the tiled path with a ragged last k tile
    # (hw = 2304, tk = 2048) to validate in-kernel masking + accumulator.
    key2 = jax.random.PRNGKey(1)
    xb = jax.random.normal(key2, (2, 4, 48, 48), dtype=jnp.float32)
    outb = jax.block_until_ready(
        global_avg_pooling(xb, block_bytes=64 * 1024))
    refb = jnp.mean(jnp.mean(xb, axis=-1), axis=-1)
    assert outb.shape == (2, 4), outb.shape
    assert jnp.allclose(outb, refb, atol=1e-5, rtol=1e-5), (
        jnp.max(jnp.abs(outb - refb)))

    print("KERNEL_OK")
</pallas_src>

<mosaic_0001>
module attributes {stable_mosaic.version = 11 : i64} {
  func.func @_gap_single_kernel(%arg0: i32, %arg1: memref<8x256xf32, #tpu.memory_space<vmem>>, %arg2: memref<8x1xf32, #tpu.memory_space<vmem>>) attributes {dimension_semantics = [#tpu.dimension_semantics<parallel>], iteration_bounds = array<i64: 1>, scalar_prefetch = 0 : i64, scratch_operands = 0 : i64, tpu.core_type = #tpu.core_type<tc>, window_params = [{transform_indices = @transform_0, window_bounds = array<i64: 8, 256>}, {transform_indices = @transform_1, window_bounds = array<i64: 8, 1>}]} {
    %c0 = arith.constant 0 : index
    %c0_0 = arith.constant 0 : index
    %0 = vector.load %arg1[%c0, %c0_0] : memref<8x256xf32, #tpu.memory_space<vmem>>, vector<8x256xf32>
    %cst = arith.constant dense<0.000000e+00> : vector<8xf32>
    %1 = vector.multi_reduction <add>, %0, %cst [1] : vector<8x256xf32> to vector<8xf32>
    %2 = vector.shape_cast %1 : vector<8xf32> to vector<8x1xf32>
    %cst_1 = arith.constant 3.906250e-03 : f32
    %3 = vector.broadcast %cst_1 : f32 to vector<8x1xf32>
    %4 = arith.mulf %2, %3 : vector<8x1xf32>
    %c0_2 = arith.constant 0 : index
    %c0_3 = arith.constant 0 : index
    %5 = vector.load %arg2[%c0_2, %c0_3] : memref<8x1xf32, #tpu.memory_space<vmem>>, vector<8x1xf32>
    tpu.vector_store %arg2[%c0_2, %c0_3], %4 {strides = array<i32>} : memref<8x1xf32, #tpu.memory_space<vmem>>, vector<8x1xf32>,
    return
  }
  func.func @transform_0(%arg0: i32) -> (i32, i32) {
    %c0_i32 = arith.constant 0 : i32
    %c0_i32_0 = arith.constant 0 : i32
    return %arg0, %c0_i32 : i32, i32
  }
  func.func @transform_1(%arg0: i32) -> (i32, i32) {
    %c0_i32 = arith.constant 0 : i32
    %c0_i32_0 = arith.constant 0 : i32
    return %arg0, %c0_i32 : i32, i32
  }
}

</mosaic_0001>

<bundles_post_ra>
// kernel: tpu_custom_call.1
= control target key start
LH: loop header
LB: loop body
LE: loop exit
PB: predicated region body
PF: predicated region fallthrough
CT: control target
= control target key end

     0   :  { %6 = vsyncpa [#allocation3], 0  ;;  %s58_s6 = smov [#allocation2]   ;;  %s84_s0 = inlined_call_operand.hbm [shape: f32[8,256], index: 0, kind: input, shape index: {}]   ;;  %s85_s1 = inlined_call_operand.vmem [shape: f32[8,1], index: 1, kind: output, shape index: {}]  }
   0x1   :  { %s13_s7 = sshll.u32 %s58_s6, 4  ;;  %s34_s10 = scalar_lea.hbm %s84_s0, 256  ;;  %s14_s7 = int_to_ptr.vmem [resolvable:$true] %s13_s7 }
   0x2   :  { %p35_p0 = scmp.ne.s32.totalorder %s84_s0, %s34_s10  ;;  %p38_p1 = scmp.lt.u32.totalorder %s34_s10, %s84_s0 }
   0x4   :  { %p40_p2 = pnand %p38_p1, %p35_p0 }
   0x6   :  { %43 = shalt.err (!%p40_p2)
}
   0x7   :  { %s44_s15 = scalar_lea.vmem %s14_s7, 256  ;;  %p49_p4 = scmp.lt.s32.totalorder %s14_s7, %s14_s7 }
   0x8   :  { %p45_p3 = scmp.ne.s32.totalorder %s14_s7, %s44_s15  ;;  %p50_p5 = scmp.lt.s32.totalorder %s44_s15, %s44_s15 }
   0xa   :  { %p51_p6 = por %p50_p5, %p49_p4 }
   0xc   :  { %p52_p7 = pnand %p51_p6, %p45_p3 }
   0xe   :  { %55 = shalt.err (!%p52_p7)
}
   0xf   :  { %16 = dma.hbm_to_vmem [thread:$0]  %s84_s0, 256, %s14_s7, [#allocation3]  }
  0x10   :  { %56 = dma.done.wait [#allocation3], 256  }
  0x11   :  { %57 = vsyncadd [#allocation3], 4294967040  ;;  %v20_v0 = vld [vmem:[#allocation2] sm:$0xff]  ;;  %v21_v1 = vld [vmem:[#allocation2 + $0x8] sm:$0xff]  ;;  %vm26_vm0 = vcmask 7168  }
  0x12   :  { %v22_v2 = vadd.f32 %v21_v1, %v20_v0 }
  0x14   :  { %23 = vadd.xlane.f32.xlu0 %v22_v2 }
  0xa1   :  { %v24_v3 = vpop.xlane.xlu0 %23 }
  0xa2   :  { %v25_v4 = vmul.f32 0.00390625, %v24_v3 }
  0xa4   :  { %27 = vst.msk [vmem:[%s85_s1] sm:$0xff] %vm26_vm0, %v25_v4 }
  0xa5   :  { %32 = vsyncpa [#allocation3], 1 }

</bundles_post_ra>
